<compile_context>
chip_gen: v6e
topology: v6e:2x2x1
jax: 0.10.0
libtpu: 0.0.40
codegen_flags: <defaults>
</compile_context>

<pallas_src>
import functools

import numpy as np

import jax
import jax.numpy as jnp
from jax.experimental import pallas as pl
from jax.experimental.pallas import tpu as pltpu


def _fused_cnn_kernel(x_ref, w0_ref, b0_ref, wmid_ref, bmid_ref, w5_ref, b5_ref,
                      mask_ref, o_ref, buf_a, buf_b, *, K, pad, Wseg, M, lengths, Nb):
    """All six conv layers for Nb lane-packed batch elements (stride == 1).

    x_ref:    (Nb, 1, L0)   raw (unpadded) single-channel inputs
    w0_ref:   (C, K)        layer-0 weights (Cin == 1 squeezed)
    b0_ref:   (C, 1)
    wmid_ref: (4, C, K*C)   layers 1..4, im2col-packed (Cout, K*Cin)
    bmid_ref: (4, C, 1)
    w5_ref:   (C, K)        layer-5 weights (Cout == 1 squeezed)
    b5_ref:   (1, 1)
    mask_ref: (6, Wt)       per-layer 0/1 validity mask over dst columns
    o_ref:    (1, 1, Nb*Lf) lane-dense packed output row
    buf_a/b:  (C, Wt)       ping-pong padded activation slabs (channels on sublane)
    """
    C, Wt = buf_a.shape
    L0 = lengths[0]
    Lf = lengths[6]
    f32 = jnp.float32

    tail = Wt - (pad + M)

    # One-time init: only the never-written pad/tail columns need zeros; every
    # column in [pad, pad+M) is (mask-)overwritten by each layer's store.
    if pad > 0:
        zcol = jnp.zeros((C, pad), f32)
        buf_a[:, 0:pad] = zcol
        buf_b[:, 0:pad] = zcol
    if tail > 0:
        ztail = jnp.zeros((C, tail), f32)
        buf_a[:, pad + M:Wt] = ztail
        buf_b[:, pad + M:Wt] = ztail

    # Place the single-channel batch inputs side-by-side in row 0 of buf_a.
    buf_a[0:1, :] = jnp.zeros((1, Wt), f32)
    for n in range(Nb):
        off = n * Wseg + pad
        buf_a[0:1, off:off + L0] = x_ref[n].astype(f32)

    def mask(layer):
        return mask_ref[layer:layer + 1, pad:pad + M]            # (1, M)

    # ---- layer 0: Cin=1 -> VPU broadcast FMAs (outer products). ----
    acc0 = jnp.zeros((C, M), f32)
    for k in range(K):
        acc0 = acc0 + w0_ref[:, k:k + 1] * buf_a[0:1, k:k + M]   # (C,1)*(1,M)
    buf_b[:, pad:pad + M] = (acc0 + b0_ref[...]) * mask(0)

    src, dst = buf_b, buf_a

    # ---- layers 1..4: im2col + one MXU matmul per layer (masked store). ----
    for li in range(1, 5):
        x_col = jnp.concatenate([src[:, k:k + M] for k in range(K)], axis=0)  # (K*C, M)
        y = jnp.dot(wmid_ref[li - 1], x_col, preferred_element_type=f32)      # (C, M)
        dst[:, pad:pad + M] = (y + bmid_ref[li - 1]) * mask(li)
        src, dst = dst, src

    # ---- layer 5: Cout=1 -> VPU multiply + sublane (XLU) reduce. ----
    acc5 = jnp.zeros((C, M), f32)
    for k in range(K):
        acc5 = acc5 + w5_ref[:, k:k + 1] * src[:, k:k + M]
    out5 = jnp.sum(acc5, axis=0, keepdims=True) + b5_ref[...]                 # (1, M)

    # Lane-dense packed output: segment n lives at out5[:, n*Wseg : n*Wseg+Lf].
    parts = [out5[:, n * Wseg:n * Wseg + Lf] for n in range(Nb)]
    out_row = parts[0] if Nb == 1 else jnp.concatenate(parts, axis=1)         # (1, Nb*Lf)
    o_ref[0] = out_row.astype(o_ref.dtype)


def _cnn_conv_ref(x_ncw, params, stride, pad):
    """Pure-JAX reference (lax conv); also the fallback for stride > 1."""
    x = x_ncw
    for (w, b) in params:
        x = jax.lax.conv_general_dilated(
            x, w, window_strides=(stride,), padding=[(pad, pad)],
            dimension_numbers=("NCH", "OIH", "NCH"),
        ) + b[None, :, None]
    return x


def _default_batch_blocks(N):
    """Split batch across TensorCores on dual-TC chips (v7x); lane-pack otherwise."""
    try:
        kind = jax.devices()[0].device_kind.lower()
    except Exception:
        return 1
    if ("v7" in kind or "7x" in kind) and N >= 2:
        return 2
    return 1


def cnn_forward(x_ncw, params, stride, pad, batch_blocks=None):
    """Fused forward pass equivalent to CNN.forward (6 chained Conv1d layers).

    x_ncw: (N, 1, L) float32, PyTorch NCW layout.
    params: list of 6 (w, b), PyTorch Conv1d weight layout (Cout, Cin, K).
    """
    N, cin0, L = x_ncw.shape
    assert cin0 == 1, "CNN expects a single input channel"
    w0, _ = params[0]
    C, _, K = w0.shape

    # Static per-layer lengths (inputs of layers 0..5, then final output).
    lengths = [L]
    for _ in range(6):
        lengths.append((lengths[-1] + 2 * pad - K) // stride + 1)
    assert all(l >= 1 for l in lengths), lengths
    Lf = lengths[6]

    if stride != 1:
        # TODO(synk): in-kernel strided taps (pl.ds(..., stride=stride)); fall back
        # to the XLA conv path so stride > 1 configs stay numerically correct.
        return _cnn_conv_ref(x_ncw.astype(jnp.float32), params, stride, pad)

    if batch_blocks is None:
        batch_blocks = _default_batch_blocks(N)
    if N % batch_blocks != 0:
        batch_blocks = 1
    Nb = N // batch_blocks

    # Per-batch segment width (covers every layer's padded input) and slab width.
    Wseg = 1
    for i in range(6):
        Wseg = max(Wseg, lengths[i] + 2 * pad, (K - 1) + lengths[i + 1] * stride)
    Wseg = max(Wseg, lengths[6] + 2 * pad)
    Wt = Nb * Wseg
    M = Wt - max(pad, K - 1)          # width of each layer's full-width store

    # Per-layer validity masks over dst columns (1 inside segment interiors).
    mask_np = np.zeros((6, Wt), np.float32)
    for li in range(5):
        lout = lengths[li + 1]
        for n in range(Nb):
            mask_np[li, n * Wseg + pad:n * Wseg + pad + lout] = 1.0
    masks = jnp.asarray(mask_np)

    # Pre-pack weights for the in-kernel layouts.
    w0p = params[0][0].reshape(C, K).astype(jnp.float32)                  # (C, K)
    b0p = params[0][1].reshape(C, 1).astype(jnp.float32)
    wmidp = jnp.stack([params[i][0].transpose(0, 2, 1).reshape(C, K * C)
                       for i in range(1, 5)]).astype(jnp.float32)         # (4, C, K*C)
    bmidp = jnp.stack([params[i][1].reshape(C, 1)
                       for i in range(1, 5)]).astype(jnp.float32)         # (4, C, 1)
    w5p = params[5][0][0].astype(jnp.float32)                             # (C, K)
    b5p = params[5][1].reshape(1, 1).astype(jnp.float32)                  # (1, 1)

    kernel = functools.partial(_fused_cnn_kernel, K=K, pad=pad, Wseg=Wseg, M=M,
                               lengths=tuple(lengths), Nb=Nb)

    out_packed = pl.pallas_call(
        kernel,
        out_shape=jax.ShapeDtypeStruct((batch_blocks, 1, Nb * Lf), jnp.float32),
        grid=(batch_blocks,),
        in_specs=[
            pl.BlockSpec((Nb, 1, L), lambda g: (g, 0, 0)),
            pl.BlockSpec((C, K), lambda g: (0, 0)),
            pl.BlockSpec((C, 1), lambda g: (0, 0)),
            pl.BlockSpec((4, C, K * C), lambda g: (0, 0, 0)),
            pl.BlockSpec((4, C, 1), lambda g: (0, 0, 0)),
            pl.BlockSpec((C, K), lambda g: (0, 0)),
            pl.BlockSpec((1, 1), lambda g: (0, 0)),
            pl.BlockSpec((6, Wt), lambda g: (0, 0)),
        ],
        out_specs=pl.BlockSpec((1, 1, Nb * Lf), lambda g: (g, 0, 0)),
        scratch_shapes=[
            pltpu.VMEM((C, Wt), jnp.float32),
            pltpu.VMEM((C, Wt), jnp.float32),
        ],
        compiler_params=pltpu.CompilerParams(dimension_semantics=("parallel",)),
    )(x_ncw.astype(jnp.float32), w0p, b0p, wmidp, bmidp, w5p, b5p, masks)

    # Packed segments are contiguous per batch element -> plain reshape back.
    return out_packed.reshape(N, 1, Lf)


def init_cnn_params(key, filtersize, numchannel):
    """Deterministic init mimicking nn.Conv1d default (uniform +/- 1/sqrt(fan_in))."""
    channels = [1] + [numchannel] * 5 + [1]
    params = []
    for i in range(6):
        cin, cout = channels[i], channels[i + 1]
        key, wkey, bkey = jax.random.split(key, 3)
        bound = 1.0 / float(cin * filtersize) ** 0.5
        w = jax.random.uniform(wkey, (cout, cin, filtersize), jnp.float32, -bound, bound)
        b = jax.random.uniform(bkey, (cout,), jnp.float32, -bound, bound)
        params.append((w, b))
    return params


if __name__ == "__main__":
    # Hyperparameters of the module (filtersize, stride, padsize, numchannel).
    filtersize, stride, padsize, numchannel = 3, 1, 1, 8
    N, L = 2, 64

    key = jax.random.PRNGKey(0)
    key, xkey = jax.random.split(key)
    x = jax.random.normal(xkey, (N, 1, L), dtype=jnp.float32)   # NCW like PyTorch

    params = init_cnn_params(key, filtersize, numchannel)

    fwd = jax.jit(lambda xx: cnn_forward(xx, params, stride, padsize))
    out = jax.block_until_ready(fwd(x))

    ref = jax.block_until_ready(_cnn_conv_ref(x, params, stride, padsize))
    assert out.shape == ref.shape, (out.shape, ref.shape)
    assert jnp.allclose(out, ref, atol=1e-4, rtol=1e-4), float(jnp.max(jnp.abs(out - ref)))

    print("KERNEL_OK")
</pallas_src>

<mosaic_0001>
module attributes {stable_mosaic.version = 11 : i64} {
  func.func @_fused_cnn_kernel(%arg0: i32, %arg1: memref<2x1x64xf32, #tpu.memory_space<vmem>>, %arg2: memref<8x3xf32, #tpu.memory_space<vmem>>, %arg3: memref<8x1xf32, #tpu.memory_space<vmem>>, %arg4: memref<4x8x24xf32, #tpu.memory_space<vmem>>, %arg5: memref<4x8x1xf32, #tpu.memory_space<vmem>>, %arg6: memref<8x3xf32, #tpu.memory_space<vmem>>, %arg7: memref<1x1xf32, #tpu.memory_space<vmem>>, %arg8: memref<6x132xf32, #tpu.memory_space<vmem>>, %arg9: memref<1x1x128xf32, #tpu.memory_space<vmem>>, %arg10: memref<8x132xf32, #tpu.memory_space<vmem>>, %arg11: memref<8x132xf32, #tpu.memory_space<vmem>>) attributes {dimension_semantics = [#tpu.dimension_semantics<parallel>], iteration_bounds = array<i64: 1>, scalar_prefetch = 0 : i64, scratch_operands = 2 : i64, tpu.core_type = #tpu.core_type<tc>, window_params = [{transform_indices = @transform_0, window_bounds = array<i64: 2, 1, 64>}, {pipeline_mode = #tpu.pipeline_mode<synchronous>, transform_indices = @transform_1, window_bounds = array<i64: 8, 3>}, {pipeline_mode = #tpu.pipeline_mode<synchronous>, transform_indices = @transform_2, window_bounds = array<i64: 8, 1>}, {pipeline_mode = #tpu.pipeline_mode<synchronous>, transform_indices = @transform_3, window_bounds = array<i64: 4, 8, 24>}, {pipeline_mode = #tpu.pipeline_mode<synchronous>, transform_indices = @transform_4, window_bounds = array<i64: 4, 8, 1>}, {pipeline_mode = #tpu.pipeline_mode<synchronous>, transform_indices = @transform_5, window_bounds = array<i64: 8, 3>}, {pipeline_mode = #tpu.pipeline_mode<synchronous>, transform_indices = @transform_6, window_bounds = array<i64: 1, 1>}, {pipeline_mode = #tpu.pipeline_mode<synchronous>, transform_indices = @transform_7, window_bounds = array<i64: 6, 132>}, {transform_indices = @transform_8, window_bounds = array<i64: 1, 1, 128>}]} {
    %cst = arith.constant 0.000000e+00 : f32
    %0 = vector.broadcast %cst : f32 to vector<8x1xf32>
    %c0 = arith.constant 0 : index
    %c0_0 = arith.constant 0 : index
    %1 = vector.load %arg10[%c0, %c0_0] : memref<8x132xf32, #tpu.memory_space<vmem>>, vector<8x1xf32>
    tpu.vector_store %arg10[%c0, %c0_0], %0 {strides = array<i32>} : memref<8x132xf32, #tpu.memory_space<vmem>>, vector<8x1xf32>,
    %c0_1 = arith.constant 0 : index
    %c0_2 = arith.constant 0 : index
    %2 = vector.load %arg11[%c0_1, %c0_2] : memref<8x132xf32, #tpu.memory_space<vmem>>, vector<8x1xf32>
    tpu.vector_store %arg11[%c0_1, %c0_2], %0 {strides = array<i32>} : memref<8x132xf32, #tpu.memory_space<vmem>>, vector<8x1xf32>,
    %cst_3 = arith.constant 0.000000e+00 : f32
    %3 = vector.broadcast %cst_3 : f32 to vector<8x1xf32>
    %c0_4 = arith.constant 0 : index
    %c131 = arith.constant 131 : index
    %4 = vector.load %arg10[%c0_4, %c131] : memref<8x132xf32, #tpu.memory_space<vmem>>, vector<8x1xf32>
    tpu.vector_store %arg10[%c0_4, %c131], %3 {strides = array<i32>} : memref<8x132xf32, #tpu.memory_space<vmem>>, vector<8x1xf32>,
    %c0_5 = arith.constant 0 : index
    %c131_6 = arith.constant 131 : index
    %5 = vector.load %arg11[%c0_5, %c131_6] : memref<8x132xf32, #tpu.memory_space<vmem>>, vector<8x1xf32>
    tpu.vector_store %arg11[%c0_5, %c131_6], %3 {strides = array<i32>} : memref<8x132xf32, #tpu.memory_space<vmem>>, vector<8x1xf32>,
    %cst_7 = arith.constant 0.000000e+00 : f32
    %6 = vector.broadcast %cst_7 : f32 to vector<1x132xf32>
    %c0_8 = arith.constant 0 : index
    %c0_9 = arith.constant 0 : index
    %7 = vector.load %arg10[%c0_8, %c0_9] : memref<8x132xf32, #tpu.memory_space<vmem>>, vector<1x132xf32>
    tpu.vector_store %arg10[%c0_8, %c0_9], %6 {strides = array<i32>} : memref<8x132xf32, #tpu.memory_space<vmem>>, vector<1x132xf32>,
    %c0_10 = arith.constant 0 : index
    %c0_11 = arith.constant 0 : index
    %c0_12 = arith.constant 0 : index
    %8 = vector.load %arg1[%c0_10, %c0_11, %c0_12] : memref<2x1x64xf32, #tpu.memory_space<vmem>>, vector<1x1x64xf32>
    %9 = vector.shape_cast %8 : vector<1x1x64xf32> to vector<1x64xf32>
    %c0_13 = arith.constant 0 : index
    %c1 = arith.constant 1 : index
    %10 = vector.load %arg10[%c0_13, %c1] : memref<8x132xf32, #tpu.memory_space<vmem>>, vector<1x64xf32>
    tpu.vector_store %arg10[%c0_13, %c1], %9 {strides = array<i32>} : memref<8x132xf32, #tpu.memory_space<vmem>>, vector<1x64xf32>,
    %c1_14 = arith.constant 1 : index
    %c0_15 = arith.constant 0 : index
    %c0_16 = arith.constant 0 : index
    %11 = vector.load %arg1[%c1_14, %c0_15, %c0_16] : memref<2x1x64xf32, #tpu.memory_space<vmem>>, vector<1x1x64xf32>
    %12 = vector.shape_cast %11 : vector<1x1x64xf32> to vector<1x64xf32>
    %c0_17 = arith.constant 0 : index
    %c67 = arith.constant 67 : index
    %13 = vector.load %arg10[%c0_17, %c67] : memref<8x132xf32, #tpu.memory_space<vmem>>, vector<1x64xf32>
    tpu.vector_store %arg10[%c0_17, %c67], %12 {strides = array<i32>} : memref<8x132xf32, #tpu.memory_space<vmem>>, vector<1x64xf32>,
    %cst_18 = arith.constant 0.000000e+00 : f32
    %14 = vector.broadcast %cst_18 : f32 to vector<8x130xf32>
    %c0_19 = arith.constant 0 : index
    %c0_20 = arith.constant 0 : index
    %15 = vector.load %arg2[%c0_19, %c0_20] : memref<8x3xf32, #tpu.memory_space<vmem>>, vector<8x1xf32>
    %c0_21 = arith.constant 0 : index
    %c0_22 = arith.constant 0 : index
    %16 = vector.load %arg10[%c0_21, %c0_22] : memref<8x132xf32, #tpu.memory_space<vmem>>, vector<1x130xf32>
    %17 = vector.broadcast %15 : vector<8x1xf32> to vector<8x130xf32>
    %18 = vector.broadcast %16 : vector<1x130xf32> to vector<8x130xf32>
    %19 = arith.mulf %17, %18 : vector<8x130xf32>
    %20 = arith.addf %14, %19 : vector<8x130xf32>
    %c0_23 = arith.constant 0 : index
    %c1_24 = arith.constant 1 : index
    %21 = vector.load %arg2[%c0_23, %c1_24] : memref<8x3xf32, #tpu.memory_space<vmem>>, vector<8x1xf32>
    %c0_25 = arith.constant 0 : index
    %c1_26 = arith.constant 1 : index
    %22 = vector.load %arg10[%c0_25, %c1_26] : memref<8x132xf32, #tpu.memory_space<vmem>>, vector<1x130xf32>
    %23 = vector.broadcast %21 : vector<8x1xf32> to vector<8x130xf32>
    %24 = vector.broadcast %22 : vector<1x130xf32> to vector<8x130xf32>
    %25 = arith.mulf %23, %24 : vector<8x130xf32>
    %26 = arith.addf %20, %25 : vector<8x130xf32>
    %c0_27 = arith.constant 0 : index
    %c2 = arith.constant 2 : index
    %27 = vector.load %arg2[%c0_27, %c2] : memref<8x3xf32, #tpu.memory_space<vmem>>, vector<8x1xf32>
    %c0_28 = arith.constant 0 : index
    %c2_29 = arith.constant 2 : index
    %28 = vector.load %arg10[%c0_28, %c2_29] : memref<8x132xf32, #tpu.memory_space<vmem>>, vector<1x130xf32>
    %29 = vector.broadcast %27 : vector<8x1xf32> to vector<8x130xf32>
    %30 = vector.broadcast %28 : vector<1x130xf32> to vector<8x130xf32>
    %31 = arith.mulf %29, %30 : vector<8x130xf32>
    %32 = arith.addf %26, %31 : vector<8x130xf32>
    %c0_30 = arith.constant 0 : index
    %c0_31 = arith.constant 0 : index
    %33 = vector.load %arg3[%c0_30, %c0_31] : memref<8x1xf32, #tpu.memory_space<vmem>>, vector<8x1xf32>
    %34 = vector.broadcast %33 : vector<8x1xf32> to vector<8x130xf32>
    %35 = arith.addf %32, %34 : vector<8x130xf32>
    %c0_32 = arith.constant 0 : index
    %c1_33 = arith.constant 1 : index
    %36 = vector.load %arg8[%c0_32, %c1_33] : memref<6x132xf32, #tpu.memory_space<vmem>>, vector<1x130xf32>
    %37 = vector.broadcast %36 : vector<1x130xf32> to vector<8x130xf32>
    %38 = arith.mulf %35, %37 : vector<8x130xf32>
    %c0_34 = arith.constant 0 : index
    %c1_35 = arith.constant 1 : index
    %39 = vector.load %arg11[%c0_34, %c1_35] : memref<8x132xf32, #tpu.memory_space<vmem>>, vector<8x130xf32>
    tpu.vector_store %arg11[%c0_34, %c1_35], %38 {strides = array<i32>} : memref<8x132xf32, #tpu.memory_space<vmem>>, vector<8x130xf32>,
    %c0_36 = arith.constant 0 : index
    %c0_37 = arith.constant 0 : index
    %40 = vector.load %arg11[%c0_36, %c0_37] : memref<8x132xf32, #tpu.memory_space<vmem>>, vector<8x130xf32>
    %c0_38 = arith.constant 0 : index
    %c1_39 = arith.constant 1 : index
    %41 = vector.load %arg11[%c0_38, %c1_39] : memref<8x132xf32, #tpu.memory_space<vmem>>, vector<8x130xf32>
    %c0_40 = arith.constant 0 : index
    %c2_41 = arith.constant 2 : index
    %42 = vector.load %arg11[%c0_40, %c2_41] : memref<8x132xf32, #tpu.memory_space<vmem>>, vector<8x130xf32>
    %43 = tpu.concatenate %40, %41, %42 in 0 : vector<8x130xf32>, vector<8x130xf32>, vector<8x130xf32> -> vector<24x130xf32>
    %c0_42 = arith.constant 0 : index
    %c0_43 = arith.constant 0 : index
    %c0_44 = arith.constant 0 : index
    %44 = vector.load %arg4[%c0_42, %c0_43, %c0_44] : memref<4x8x24xf32, #tpu.memory_space<vmem>>, vector<1x8x24xf32>
    %45 = vector.shape_cast %44 : vector<1x8x24xf32> to vector<8x24xf32>
    %cst_45 = arith.constant dense<0.000000e+00> : vector<8x130xf32>
    %46 = tpu.matmul %45, %43, %cst_45 {dimension_numbers = #tpu.dot_dimension_numbers<[1], [0], [0], [1], [0, 0, 1, 1], [], []>} : vector<8x24xf32>, vector<24x130xf32>, vector<8x130xf32> -> vector<8x130xf32>
    %c0_46 = arith.constant 0 : index
    %c0_47 = arith.constant 0 : index
    %c0_48 = arith.constant 0 : index
    %47 = vector.load %arg5[%c0_46, %c0_47, %c0_48] : memref<4x8x1xf32, #tpu.memory_space<vmem>>, vector<1x8x1xf32>
    %48 = vector.shape_cast %47 : vector<1x8x1xf32> to vector<8x1xf32>
    %49 = vector.broadcast %48 : vector<8x1xf32> to vector<8x130xf32>
    %50 = arith.addf %46, %49 : vector<8x130xf32>
    %c1_49 = arith.constant 1 : index
    %c1_50 = arith.constant 1 : index
    %51 = vector.load %arg8[%c1_49, %c1_50] : memref<6x132xf32, #tpu.memory_space<vmem>>, vector<1x130xf32>
    %52 = vector.broadcast %51 : vector<1x130xf32> to vector<8x130xf32>
    %53 = arith.mulf %50, %52 : vector<8x130xf32>
    %c0_51 = arith.constant 0 : index
    %c1_52 = arith.constant 1 : index
    %54 = vector.load %arg10[%c0_51, %c1_52] : memref<8x132xf32, #tpu.memory_space<vmem>>, vector<8x130xf32>
    tpu.vector_store %arg10[%c0_51, %c1_52], %53 {strides = array<i32>} : memref<8x132xf32, #tpu.memory_space<vmem>>, vector<8x130xf32>,
    %c0_53 = arith.constant 0 : index
    %c0_54 = arith.constant 0 : index
    %55 = vector.load %arg10[%c0_53, %c0_54] : memref<8x132xf32, #tpu.memory_space<vmem>>, vector<8x130xf32>
    %c0_55 = arith.constant 0 : index
    %c1_56 = arith.constant 1 : index
    %56 = vector.load %arg10[%c0_55, %c1_56] : memref<8x132xf32, #tpu.memory_space<vmem>>, vector<8x130xf32>
    %c0_57 = arith.constant 0 : index
    %c2_58 = arith.constant 2 : index
    %57 = vector.load %arg10[%c0_57, %c2_58] : memref<8x132xf32, #tpu.memory_space<vmem>>, vector<8x130xf32>
    %58 = tpu.concatenate %55, %56, %57 in 0 : vector<8x130xf32>, vector<8x130xf32>, vector<8x130xf32> -> vector<24x130xf32>
    %c1_59 = arith.constant 1 : index
    %c0_60 = arith.constant 0 : index
    %c0_61 = arith.constant 0 : index
    %59 = vector.load %arg4[%c1_59, %c0_60, %c0_61] : memref<4x8x24xf32, #tpu.memory_space<vmem>>, vector<1x8x24xf32>
    %60 = vector.shape_cast %59 : vector<1x8x24xf32> to vector<8x24xf32>
    %cst_62 = arith.constant dense<0.000000e+00> : vector<8x130xf32>
    %61 = tpu.matmul %60, %58, %cst_62 {dimension_numbers = #tpu.dot_dimension_numbers<[1], [0], [0], [1], [0, 0, 1, 1], [], []>} : vector<8x24xf32>, vector<24x130xf32>, vector<8x130xf32> -> vector<8x130xf32>
    %c1_63 = arith.constant 1 : index
    %c0_64 = arith.constant 0 : index
    %c0_65 = arith.constant 0 : index
    %62 = vector.load %arg5[%c1_63, %c0_64, %c0_65] : memref<4x8x1xf32, #tpu.memory_space<vmem>>, vector<1x8x1xf32>
    %63 = vector.shape_cast %62 : vector<1x8x1xf32> to vector<8x1xf32>
    %64 = vector.broadcast %63 : vector<8x1xf32> to vector<8x130xf32>
    %65 = arith.addf %61, %64 : vector<8x130xf32>
    %c2_66 = arith.constant 2 : index
    %c1_67 = arith.constant 1 : index
    %66 = vector.load %arg8[%c2_66, %c1_67] : memref<6x132xf32, #tpu.memory_space<vmem>>, vector<1x130xf32>
    %67 = vector.broadcast %66 : vector<1x130xf32> to vector<8x130xf32>
    %68 = arith.mulf %65, %67 : vector<8x130xf32>
    %c0_68 = arith.constant 0 : index
    %c1_69 = arith.constant 1 : index
    %69 = vector.load %arg11[%c0_68, %c1_69] : memref<8x132xf32, #tpu.memory_space<vmem>>, vector<8x130xf32>
    tpu.vector_store %arg11[%c0_68, %c1_69], %68 {strides = array<i32>} : memref<8x132xf32, #tpu.memory_space<vmem>>, vector<8x130xf32>,
    %c0_70 = arith.constant 0 : index
    %c0_71 = arith.constant 0 : index
    %70 = vector.load %arg11[%c0_70, %c0_71] : memref<8x132xf32, #tpu.memory_space<vmem>>, vector<8x130xf32>
    %c0_72 = arith.constant 0 : index
    %c1_73 = arith.constant 1 : index
    %71 = vector.load %arg11[%c0_72, %c1_73] : memref<8x132xf32, #tpu.memory_space<vmem>>, vector<8x130xf32>
    %c0_74 = arith.constant 0 : index
    %c2_75 = arith.constant 2 : index
    %72 = vector.load %arg11[%c0_74, %c2_75] : memref<8x132xf32, #tpu.memory_space<vmem>>, vector<8x130xf32>
    %73 = tpu.concatenate %70, %71, %72 in 0 : vector<8x130xf32>, vector<8x130xf32>, vector<8x130xf32> -> vector<24x130xf32>
    %c2_76 = arith.constant 2 : index
    %c0_77 = arith.constant 0 : index
    %c0_78 = arith.constant 0 : index
    %74 = vector.load %arg4[%c2_76, %c0_77, %c0_78] : memref<4x8x24xf32, #tpu.memory_space<vmem>>, vector<1x8x24xf32>
    %75 = vector.shape_cast %74 : vector<1x8x24xf32> to vector<8x24xf32>
    %cst_79 = arith.constant dense<0.000000e+00> : vector<8x130xf32>
    %76 = tpu.matmul %75, %73, %cst_79 {dimension_numbers = #tpu.dot_dimension_numbers<[1], [0], [0], [1], [0, 0, 1, 1], [], []>} : vector<8x24xf32>, vector<24x130xf32>, vector<8x130xf32> -> vector<8x130xf32>
    %c2_80 = arith.constant 2 : index
    %c0_81 = arith.constant 0 : index
    %c0_82 = arith.constant 0 : index
    %77 = vector.load %arg5[%c2_80, %c0_81, %c0_82] : memref<4x8x1xf32, #tpu.memory_space<vmem>>, vector<1x8x1xf32>
    %78 = vector.shape_cast %77 : vector<1x8x1xf32> to vector<8x1xf32>
    %79 = vector.broadcast %78 : vector<8x1xf32> to vector<8x130xf32>
    %80 = arith.addf %76, %79 : vector<8x130xf32>
    %c3 = arith.constant 3 : index
    %c1_83 = arith.constant 1 : index
    %81 = vector.load %arg8[%c3, %c1_83] : memref<6x132xf32, #tpu.memory_space<vmem>>, vector<1x130xf32>
    %82 = vector.broadcast %81 : vector<1x130xf32> to vector<8x130xf32>
    %83 = arith.mulf %80, %82 : vector<8x130xf32>
    %c0_84 = arith.constant 0 : index
    %c1_85 = arith.constant 1 : index
    %84 = vector.load %arg10[%c0_84, %c1_85] : memref<8x132xf32, #tpu.memory_space<vmem>>, vector<8x130xf32>
    tpu.vector_store %arg10[%c0_84, %c1_85], %83 {strides = array<i32>} : memref<8x132xf32, #tpu.memory_space<vmem>>, vector<8x130xf32>,
    %c0_86 = arith.constant 0 : index
    %c0_87 = arith.constant 0 : index
    %85 = vector.load %arg10[%c0_86, %c0_87] : memref<8x132xf32, #tpu.memory_space<vmem>>, vector<8x130xf32>
    %c0_88 = arith.constant 0 : index
    %c1_89 = arith.constant 1 : index
    %86 = vector.load %arg10[%c0_88, %c1_89] : memref<8x132xf32, #tpu.memory_space<vmem>>, vector<8x130xf32>
    %c0_90 = arith.constant 0 : index
    %c2_91 = arith.constant 2 : index
    %87 = vector.load %arg10[%c0_90, %c2_91] : memref<8x132xf32, #tpu.memory_space<vmem>>, vector<8x130xf32>
    %88 = tpu.concatenate %85, %86, %87 in 0 : vector<8x130xf32>, vector<8x130xf32>, vector<8x130xf32> -> vector<24x130xf32>
    %c3_92 = arith.constant 3 : index
    %c0_93 = arith.constant 0 : index
    %c0_94 = arith.constant 0 : index
    %89 = vector.load %arg4[%c3_92, %c0_93, %c0_94] : memref<4x8x24xf32, #tpu.memory_space<vmem>>, vector<1x8x24xf32>
    %90 = vector.shape_cast %89 : vector<1x8x24xf32> to vector<8x24xf32>
    %cst_95 = arith.constant dense<0.000000e+00> : vector<8x130xf32>
    %91 = tpu.matmul %90, %88, %cst_95 {dimension_numbers = #tpu.dot_dimension_numbers<[1], [0], [0], [1], [0, 0, 1, 1], [], []>} : vector<8x24xf32>, vector<24x130xf32>, vector<8x130xf32> -> vector<8x130xf32>
    %c3_96 = arith.constant 3 : index
    %c0_97 = arith.constant 0 : index
    %c0_98 = arith.constant 0 : index
    %92 = vector.load %arg5[%c3_96, %c0_97, %c0_98] : memref<4x8x1xf32, #tpu.memory_space<vmem>>, vector<1x8x1xf32>
    %93 = vector.shape_cast %92 : vector<1x8x1xf32> to vector<8x1xf32>
    %94 = vector.broadcast %93 : vector<8x1xf32> to vector<8x130xf32>
    %95 = arith.addf %91, %94 : vector<8x130xf32>
    %c4 = arith.constant 4 : index
    %c1_99 = arith.constant 1 : index
    %96 = vector.load %arg8[%c4, %c1_99] : memref<6x132xf32, #tpu.memory_space<vmem>>, vector<1x130xf32>
    %97 = vector.broadcast %96 : vector<1x130xf32> to vector<8x130xf32>
    %98 = arith.mulf %95, %97 : vector<8x130xf32>
    %c0_100 = arith.constant 0 : index
    %c1_101 = arith.constant 1 : index
    %99 = vector.load %arg11[%c0_100, %c1_101] : memref<8x132xf32, #tpu.memory_space<vmem>>, vector<8x130xf32>
    tpu.vector_store %arg11[%c0_100, %c1_101], %98 {strides = array<i32>} : memref<8x132xf32, #tpu.memory_space<vmem>>, vector<8x130xf32>,
    %cst_102 = arith.constant 0.000000e+00 : f32
    %100 = vector.broadcast %cst_102 : f32 to vector<8x130xf32>
    %c0_103 = arith.constant 0 : index
    %c0_104 = arith.constant 0 : index
    %101 = vector.load %arg6[%c0_103, %c0_104] : memref<8x3xf32, #tpu.memory_space<vmem>>, vector<8x1xf32>
    %c0_105 = arith.constant 0 : index
    %c0_106 = arith.constant 0 : index
    %102 = vector.load %arg11[%c0_105, %c0_106] : memref<8x132xf32, #tpu.memory_space<vmem>>, vector<8x130xf32>
    %103 = vector.broadcast %101 : vector<8x1xf32> to vector<8x130xf32>
    %104 = arith.mulf %103, %102 : vector<8x130xf32>
    %105 = arith.addf %100, %104 : vector<8x130xf32>
    %c0_107 = arith.constant 0 : index
    %c1_108 = arith.constant 1 : index
    %106 = vector.load %arg6[%c0_107, %c1_108] : memref<8x3xf32, #tpu.memory_space<vmem>>, vector<8x1xf32>
    %c0_109 = arith.constant 0 : index
    %c1_110 = arith.constant 1 : index
    %107 = vector.load %arg11[%c0_109, %c1_110] : memref<8x132xf32, #tpu.memory_space<vmem>>, vector<8x130xf32>
    %108 = vector.broadcast %106 : vector<8x1xf32> to vector<8x130xf32>
    %109 = arith.mulf %108, %107 : vector<8x130xf32>
    %110 = arith.addf %105, %109 : vector<8x130xf32>
    %c0_111 = arith.constant 0 : index
    %c2_112 = arith.constant 2 : index
    %111 = vector.load %arg6[%c0_111, %c2_112] : memref<8x3xf32, #tpu.memory_space<vmem>>, vector<8x1xf32>
    %c0_113 = arith.constant 0 : index
    %c2_114 = arith.constant 2 : index
    %112 = vector.load %arg11[%c0_113, %c2_114] : memref<8x132xf32, #tpu.memory_space<vmem>>, vector<8x130xf32>
    %113 = vector.broadcast %111 : vector<8x1xf32> to vector<8x130xf32>
    %114 = arith.mulf %113, %112 : vector<8x130xf32>
    %115 = arith.addf %110, %114 : vector<8x130xf32>
    %cst_115 = arith.constant dense<0.000000e+00> : vector<130xf32>
    %116 = vector.multi_reduction <add>, %115, %cst_115 [0] : vector<8x130xf32> to vector<130xf32>
    %117 = vector.shape_cast %116 : vector<130xf32> to vector<1x130xf32>
    %c0_116 = arith.constant 0 : index
    %c0_117 = arith.constant 0 : index
    %118 = vector.load %arg7[%c0_116, %c0_117] : memref<1x1xf32, #tpu.memory_space<vmem>>, vector<1x1xf32>
    %119 = vector.broadcast %118 : vector<1x1xf32> to vector<1x130xf32>
    %120 = arith.addf %117, %119 : vector<1x130xf32>
    %121 = vector.extract_strided_slice %120 {offsets = [0, 0], sizes = [1, 64], strides = [1, 1]} : vector<1x130xf32> to vector<1x64xf32>
    %122 = vector.extract_strided_slice %120 {offsets = [0, 66], sizes = [1, 64], strides = [1, 1]} : vector<1x130xf32> to vector<1x64xf32>
    %123 = tpu.concatenate %121, %122 in 1 : vector<1x64xf32>, vector<1x64xf32> -> vector<1x128xf32>
    %c0_118 = arith.constant 0 : index
    %c0_119 = arith.constant 0 : index
    %c0_120 = arith.constant 0 : index
    %124 = vector.load %arg9[%c0_118, %c0_119, %c0_120] : memref<1x1x128xf32, #tpu.memory_space<vmem>>, vector<1x1x128xf32>
    %125 = vector.shape_cast %124 : vector<1x1x128xf32> to vector<1x128xf32>
    %126 = vector.shape_cast %123 : vector<1x128xf32> to vector<1x1x128xf32>
    tpu.vector_store %arg9[%c0_118, %c0_119, %c0_120], %126 {strides = array<i32>} : memref<1x1x128xf32, #tpu.memory_space<vmem>>, vector<1x1x128xf32>,
    return
  }
  func.func @transform_0(%arg0: i32) -> (i32, i32, i32) {
    %c0_i32 = arith.constant 0 : i32
    %c0_i32_0 = arith.constant 0 : i32
    %c0_i32_1 = arith.constant 0 : i32
    return %arg0, %c0_i32, %c0_i32_0 : i32, i32, i32
  }
  func.func @transform_1(%arg0: i32) -> (i32, i32) {
    %c0_i32 = arith.constant 0 : i32
    %c0_i32_0 = arith.constant 0 : i32
    %c0_i32_1 = arith.constant 0 : i32
    return %c0_i32, %c0_i32_0 : i32, i32
  }
  func.func @transform_2(%arg0: i32) -> (i32, i32) {
    %c0_i32 = arith.constant 0 : i32
    %c0_i32_0 = arith.constant 0 : i32
    %c0_i32_1 = arith.constant 0 : i32
    return %c0_i32, %c0_i32_0 : i32, i32
  }
  func.func @transform_3(%arg0: i32) -> (i32, i32, i32) {
    %c0_i32 = arith.constant 0 : i32
    %c0_i32_0 = arith.constant 0 : i32
    %c0_i32_1 = arith.constant 0 : i32
    %c0_i32_2 = arith.constant 0 : i32
    return %c0_i32, %c0_i32_0, %c0_i32_1 : i32, i32, i32
  }
  func.func @transform_4(%arg0: i32) -> (i32, i32, i32) {
    %c0_i32 = arith.constant 0 : i32
    %c0_i32_0 = arith.constant 0 : i32
    %c0_i32_1 = arith.constant 0 : i32
    %c0_i32_2 = arith.constant 0 : i32
    return %c0_i32, %c0_i32_0, %c0_i32_1 : i32, i32, i32
  }
  func.func @transform_5(%arg0: i32) -> (i32, i32) {
    %c0_i32 = arith.constant 0 : i32
    %c0_i32_0 = arith.constant 0 : i32
    %c0_i32_1 = arith.constant 0 : i32
    return %c0_i32, %c0_i32_0 : i32, i32
  }
  func.func @transform_6(%arg0: i32) -> (i32, i32) {
    %c0_i32 = arith.constant 0 : i32
    %c0_i32_0 = arith.constant 0 : i32
    %c0_i32_1 = arith.constant 0 : i32
    return %c0_i32, %c0_i32_0 : i32, i32
  }
  func.func @transform_7(%arg0: i32) -> (i32, i32) {
    %c0_i32 = arith.constant 0 : i32
    %c0_i32_0 = arith.constant 0 : i32
    %c0_i32_1 = arith.constant 0 : i32
    return %c0_i32, %c0_i32_0 : i32, i32
  }
  func.func @transform_8(%arg0: i32) -> (i32, i32, i32) {
    %c0_i32 = arith.constant 0 : i32
    %c0_i32_0 = arith.constant 0 : i32
    %c0_i32_1 = arith.constant 0 : i32
    return %arg0, %c0_i32, %c0_i32_0 : i32, i32, i32
  }
}

</mosaic_0001>

<bundles_post_ra>
// kernel: _lambda_.1
= control target key start
LH: loop header
LB: loop body
LE: loop exit
PB: predicated region body
PF: predicated region fallthrough
CT: control target
= control target key end

     0   :  { %s1235_s0 = inlined_call_operand.hbm [shape: f32[2,1,64], index: 0, kind: input, shape index: {}]   ;;  %s1236_s1 = inlined_call_operand.hbm [shape: f32[8,3], index: 1, kind: input, shape index: {}]   ;;  %s1237_s2 = inlined_call_operand.hbm [shape: f32[8,1], index: 2, kind: input, shape index: {}]   ;;  %s1238_s3 = inlined_call_operand.hbm [shape: f32[4,8,24], index: 3, kind: input, shape index: {}]   ;;  %s1239_s4 = inlined_call_operand.hbm [shape: f32[4,8,1], index: 4, kind: input, shape index: {}]   ;;  %s1240_s5 = inlined_call_operand.vmem [shape: f32[8,3], index: 5, kind: input, shape index: {}]   ;;  %s1241_s6 = inlined_call_operand.<no memory space> [shape: f32[1,1], index: 6, kind: input, shape index: {}]   ;;  %s1242_s7 = inlined_call_operand.hbm [shape: f32[6,132], index: 7, kind: input, shape index: {}]   ;;  %s1243_s8 = inlined_call_operand.vmem [shape: f32[1,1,128], index: 8, kind: output, shape index: {}]  }
   0x1   :  { %v13_v0 = vstv %s1241_s6 }
   0x2   :  { %14 = vst [vmem:[#allocation4] sm:$0x1] %v13_v0 }
   0x3   :  { %15 = vsyncpa [#allocation6], 0 }
   0x4   :  { %16 = vsyncpa [#allocation8], 0 }
   0x5   :  { %17 = vsyncpa [#allocation11], 0 }
   0x6   :  { %18 = vsyncpa [#allocation14], 0  ;;  %s1019_s29 = smov [#allocation7]   ;;  %s1020_s9 = smov [#allocation10]  }
   0x7   :  { %s37_s30 = sshll.u32 %s1019_s29, 4  ;;  %s56_s10 = sshll.u32 %s1020_s9, 4  ;;  %s38_s30 = int_to_ptr.vmem [resolvable:$true] %s37_s30  ;;  %s57_s10 = int_to_ptr.vmem [resolvable:$true] %s56_s10 }
   0x8   :  { %s899_s11 = scalar_lea.vmem %s38_s30, 128  ;;  %p904_p1 = scmp.lt.s32.totalorder %s38_s30, %s38_s30 }
   0x9   :  { %p900_p0 = scmp.ne.s32.totalorder %s38_s30, %s899_s11  ;;  %p905_p2 = scmp.lt.s32.totalorder %s899_s11, %s899_s11 }
   0xb   :  { %p906_p3 = por %p905_p2, %p904_p1 }
   0xd   :  { %p907_p4 = pnand %p906_p3, %p900_p0 }
   0xf   :  { %910 = shalt.err (!%p907_p4)
}
  0x10   :  { %40 = dma.hbm_to_vmem [thread:$0]  %s1236_s1, 128, %s38_s30, [#allocation8]  }
  0x11   :  { %s919_s13 = scalar_lea.vmem %s57_s10, 512  ;;  %p924_p6 = scmp.lt.s32.totalorder %s57_s10, %s57_s10 }
  0x12   :  { %p920_p5 = scmp.ne.s32.totalorder %s57_s10, %s919_s13  ;;  %p925_p7 = scmp.lt.s32.totalorder %s919_s13, %s919_s13 }
  0x14   :  { %p926_p8 = por %p925_p7, %p924_p6 }
  0x16   :  { %p927_p9 = pnand %p926_p8, %p920_p5 }
  0x18   :  { %930 = shalt.err (!%p927_p9)
}
  0x19   :  { %s1021_s14 = smov 128   ;;  %s1022_s15 = smov 8  }
  0x1a   :  { %62 = dma.hbm_to_vmem [thread:$0]  %s1238_s3, 512, %s57_s10, [#allocation11], %s1021_s14, %s1021_s14, %s1022_s15  }
  0x1b   :  { %s1023_s18 = smov [#allocation5]  }
  0x1c   :  { %s24_s19 = sshll.u32 %s1023_s18, 4  ;;  %s25_s19 = int_to_ptr.vmem [resolvable:$true] %s24_s19 }
  0x1d   :  { %s939_s1 = scalar_lea.vmem %s25_s19, 32  ;;  %p944_p11 = scmp.lt.s32.totalorder %s25_s19, %s25_s19 }
  0x1e   :  { %p940_p10 = scmp.ne.s32.totalorder %s25_s19, %s939_s1  ;;  %p945_p12 = scmp.lt.s32.totalorder %s939_s1, %s939_s1 }
  0x20   :  { %p946_p13 = por %p945_p12, %p944_p11 }
  0x22   :  { %p947_p0 = pnand %p946_p13, %p940_p10 }
  0x24   :  { %950 = shalt.err (!%p947_p0)
}
  0x25   :  { %s1024_s20 = smov 16   ;;  %s1025_s21 = smov 1  }
  0x26   :  { %30 = dma.hbm_to_vmem [thread:$0]  %s1235_s0, 32, %s25_s19, [#allocation6], %s1024_s20, %s1024_s20, %s1025_s21  }
  0x27   :  { %s1026_s24 = smov [#allocation9]   ;;  %s1027_s3 = smov [#allocation12]  }
  0x28   :  { %s47_s25 = sshll.u32 %s1026_s24, 4  ;;  %s68_s26 = sshll.u32 %s1027_s3, 4  ;;  %s48_s25 = int_to_ptr.vmem [resolvable:$true] %s47_s25  ;;  %s69_s26 = int_to_ptr.vmem [resolvable:$true] %s68_s26 }
  0x29   :  { %s959_s27 = scalar_lea.vmem %s48_s25, 128  ;;  %p964_p2 = scmp.lt.s32.totalorder %s48_s25, %s48_s25 }
  0x2a   :  { %p960_p1 = scmp.ne.s32.totalorder %s48_s25, %s959_s27  ;;  %p965_p3 = scmp.lt.s32.totalorder %s959_s27, %s959_s27 }
  0x2c   :  { %p966_p4 = por %p965_p3, %p964_p2 }
  0x2e   :  { %p967_p5 = pnand %p966_p4, %p960_p1 }
  0x30   :  { %970 = shalt.err (!%p967_p5)
}
  0x31   :  { %50 = dma.hbm_to_vmem [thread:$0]  %s1237_s2, 128, %s48_s25, [#allocation8]  }
  0x32   :  { %s979_s30 = scalar_lea.vmem %s69_s26, 512  ;;  %p984_p7 = scmp.lt.s32.totalorder %s69_s26, %s69_s26 }
  0x33   :  { %p980_p6 = scmp.ne.s32.totalorder %s69_s26, %s979_s30  ;;  %p985_p8 = scmp.lt.s32.totalorder %s979_s30, %s979_s30 }
  0x35   :  { %p986_p9 = por %p985_p8, %p984_p7 }
  0x37   :  { %p987_p10 = pnand %p986_p9, %p980_p6 }
  0x39   :  { %990 = shalt.err (!%p987_p10)
}
  0x3a   :  { %74 = dma.hbm_to_vmem [thread:$0]  %s1239_s4, 512, %s69_s26, [#allocation11], %s1021_s14, %s1021_s14, %s1022_s15  }
  0x3b   :  { %s1028_s10 = smov [#allocation13]  }
  0x3c   :  { %s85_s11 = sshll.u32 %s1028_s10, 4  ;;  %s86_s11 = int_to_ptr.vmem [resolvable:$true] %s85_s11 }
  0x3d   :  { %s999_s12 = scalar_lea.vmem %s86_s11, 256  ;;  %p1004_p12 = scmp.lt.s32.totalorder %s86_s11, %s86_s11 }
  0x3e   :  { %p1000_p11 = scmp.ne.s32.totalorder %s86_s11, %s999_s12  ;;  %p1005_p13 = scmp.lt.s32.totalorder %s999_s12, %s999_s12 }
  0x40   :  { %p1006_p0 = por %p1005_p13, %p1004_p12 }
  0x42   :  { %p1007_p1 = pnand %p1006_p0, %p1000_p11 }
  0x44   :  { %1010 = shalt.err (!%p1007_p1)
}
  0x45   :  { %88 = dma.hbm_to_vmem [thread:$0]  %s1242_s7, 256, %s86_s11, [#allocation14]  }
  0x46   :  { %1011 = dma.done.wait [#allocation6], 32  }
  0x47   :  { %1012 = vsyncadd [#allocation6], 4294967264 }
  0x48   :  { %1013 = dma.done.wait [#allocation8], 256  }
  0x49   :  { %1014 = vsyncadd [#allocation8], 4294967040 }
  0x4a   :  { %1015 = dma.done.wait [#allocation11], 1024  }
  0x4b   :  { %1016 = vsyncadd [#allocation11], 4294966272 }
  0x4c   :  { %1017 = dma.done.wait [#allocation14], 256  }
  0x4d   :  { %1018 = vsyncadd [#allocation14], 4294967040  ;;  %v113_v1 = vlaneseq  ;;  %v1029_v2 = vmov 1   ;;  %v1030_v3 = vmov 0   ;;  %vm107_vm0 = vcmask 7168   ;;  %v144_v5 = vld [vmem:[#allocation7] sm:$0xff] }
  0x4e   :  { %883 = vset.pattern.permute.xlu1 %v1029_v2  ;;  %885 = vset.pattern.permute.xlu0 %v1030_v3  ;;  %vm110_vm1 = vcmask 31768   ;;  %v1031_v4 = vmov 0.0   ;;  %v860_v6 = vld [vmem:[#allocation5] ss:$0 sm:$0xff]  ;;  %v861_v7 = vld [vmem:[#allocation5 + $0x1] ss:$0 sm:$0xff] }
  0x4f   :  { %vm115_vm2 = vcmp.lt.s32.totalorder %v113_v1, 132  ;;  %108 = vst.msk [vmem:[#allocation2] sm:$0xff] %vm107_vm0, %v1031_v4  ;;  %109 = vst.msk [vmem:[#allocation3] sm:$0xff] %vm107_vm0, %v1031_v4  ;;  %335 = vmatprep.mubr.f32.mxu0 %v1031_v4  ;;  %467 = vmatprep.mubr.f32.mxu1 %v1031_v4  ;;  %v1032_v8 = vmov 2   ;;  %s1033_s4 = smov 67   ;;  %v202_v9 = vld [vmem:[#allocation9] sm:$0xff] }
  0x50   :  { %111 = vst.msk [vmem:[#allocation2 + $0x8] sm:$0xff] %vm110_vm1, %v1031_v4  ;;  %112 = vst.msk [vmem:[#allocation3 + $0x8] sm:$0xff] %vm110_vm1, %v1031_v4  ;;  %167 = vperm.xlu1 %883, %v144_v5   ;;  %125 = vrot.lane.b32.xlu0 %v860_v6, %s1025_s21  ;;  %vm128_vm3 = vcmask 524296   ;;  %vm140_vm4 = vcmask 1040920   ;;  %vm142_vm5 = vcmask 16384   ;;  %v153_v12 = vshrl.u32 %v113_v1, 7 }
  0x51   :  { %117 = vst.msk [vmem:[#allocation2] ss:$8 sm:$0x3] %vm115_vm2, %v1031_v4  ;;  %v210_v20 = vld [vmem:[#allocation13] ss:$8 sm:$0x3] }
  0x52   :  { %v1123_v13 = vsub.s32 0, %v153_v12  ;;  %v1125_v14 = vsub.s32 1, %v153_v12  ;;  %s1034_s7 = smov 126   ;;  %s1035_s13 = smov 127   ;;  %vm178_vm6 = vcmask 1039360   ;;  %vm196_vm7 = vcmask 1031168  }
  0x53   :  { %vm238_vm8 = vcmask 1047560   ;;  %vm240_vm9 = vcmask 23552   ;;  %v343_v53 = vld [vmem:[#allocation13 + $0x1] ss:$8 sm:$0x3]  ;;  %vm267_vm10 = vcmask 195584  }
  0x54   :  { %884 = vset.pattern.permute.xlu1 %v1032_v8  ;;  %137 = vrot.lane.b32.xlu0 %v861_v7, %s1033_s4  ;;  %v219_v23 = vrot.slane %v210_v20, %v1125_v14  ;;  %v215_v26 = vrot.slane %v210_v20, %v1123_v13  ;;  %v261_v54 = vld [vmem:[#allocation12] sm:$0xff]  ;;  %v348_v55 = vrot.slane %v343_v53, %v1123_v13  ;;  %vm821_vm11 = vcmask 15360  }
  0x55   :  { %185 = vperm.xlu1 %884, %v144_v5   ;;  %v352_v56 = vrot.slane %v343_v53, %v1125_v14  ;;  %v260_v63 = vld [vmem:[#allocation10] sm:$0xff]  ;;  %vm849_vm12 = vcmask 523264  }
  0x58   :  { %148 = vperm.xlu0 %885, %v144_v5  }
  0x59   :  { %886 = vset.pattern.permute.xlu1 %v1030_v3 }
  0x5c   :  { %205 = vperm.xlu0 %885, %v202_v9  }
  0xc2   :  { %v126_v10 = vpop.permute.xlu0 %125 }
  0xc3   :  { %129 = vst.msk [vmem:[#allocation2] sm:$0x1] %vm128_vm3, %v126_v10 }
  0xc6   :  { %v138_v11 = vpop.permute.xlu0 %137 }
  0xc7   :  { %141 = vst.msk [vmem:[#allocation2] sm:$0x1] %vm140_vm4, %v138_v11 }
  0xc8   :  { %143 = vst.msk [vmem:[#allocation2 + $0x8] sm:$0x1] %vm142_vm5, %v138_v11 }
  0xcb   :  { %v168_v15 = vpop.permute.xlu1 %167 }
  0xcf   :  { %v145_v16 = vld [vmem:[#allocation2] ss:$8 sm:$0x3] }
  0xd0   :  { %v155_v17 = vrot.slane %v145_v16, %v1123_v13  ;;  %v159_v18 = vrot.slane %v145_v16, %v1125_v14  ;;  %v186_v19 = vpop.permute.xlu1 %185 }
  0xd2   :  { %v170_v21 = vmul.f32 %v168_v15, %v155_v17  ;;  %v189_v22 = vmul.f32 %v186_v19, %v159_v18  ;;  %v171_v24 = vmul.f32 %v168_v15, %v159_v18  ;;  %v188_v25 = vmul.f32 %v186_v19, %v155_v17 }
  0xd3   :  { %v149_v27 = vpop.permute.xlu0 %148 }
  0xd4   :  { %194 = vrot.lane.b32.xlu0 %v189_v22, %s1034_s7  ;;  %174 = vrot.lane.b32.xlu1 %v170_v21, %s1035_s13  ;;  %v163_v30 = vmul.f32 %v159_v18, %v149_v27  ;;  %v162_v35 = vmul.f32 %v155_v17, %v149_v27  ;;  %v475_v21 = vld [vmem:[#allocation13 + $0x2] ss:$8 sm:$0x3] }
  0xd5   :  { %v394_v22 = vld [vmem:[#allocation12 + $0x8] sm:$0xff] }
  0xd7   :  { %v206_v28 = vpop.permute.xlu0 %205 }
  0xd8   :  { %176 = vrot.lane.b32.xlu1 %v171_v24, %s1035_s13  ;;  %222 = vrot.lane.b32.xlu0 %v219_v23, %s1035_s13  ;;  %v480_v23 = vrot.slane %v475_v21, %v1123_v13  ;;  %v484_v24 = vrot.slane %v475_v21, %v1125_v14 }
  0xdc   :  { %192 = vrot.lane.b32.xlu1 %v188_v25, %s1034_s7 }
  0xe0   :  { %220 = vrot.lane.b32.xlu1 %v215_v26, %s1035_s13 }
 0x146   :  { %v175_v29 = vpop.permute.xlu1 %174  ;;  %v195_v31 = vpop.permute.xlu0 %194 }
 0x14a   :  { %v177_v32 = vpop.permute.xlu1 %176  ;;  %v223_v39 = vpop.permute.xlu0 %222 }
 0x14b   :  { %v179_v33 = vsel %vm178_vm6, %v175_v29, %v177_v32  ;;  %v183_v34 = vadd.f32 %v177_v32, %v163_v30 }
 0x14c   :  { %v182_v37 = vadd.f32 %v179_v33, %v162_v35 }
 0x14d   :  { %v201_v36 = vadd.f32 %v195_v31, %v183_v34 }
 0x14e   :  { %v193_v38 = vpop.permute.xlu1 %192 }
 0x14f   :  { %v197_v40 = vsel %vm196_vm7, %v193_v38, %v195_v31  ;;  %v209_v41 = vadd.f32 %v206_v28, %v201_v36  ;;  %v392_v31 = vld [vmem:[#allocation10 + $0x8] sm:$0xff] }
 0x150   :  { %v200_v42 = vadd.f32 %v197_v40, %v182_v37 }
 0x151   :  { %v228_v43 = vmul.f32 %v223_v39, %v209_v41 }
 0x152   :  { %v221_v44 = vpop.permute.xlu1 %220  ;;  %v208_v45 = vadd.f32 %v206_v28, %v200_v42 }
 0x153   :  { %v224_v46 = vsel %vm178_vm6, %v221_v44, %v223_v39  ;;  %233 = vrot.lane.b32.xlu0 %v228_v43, %s1025_s21 }
 0x154   :  { %v227_v47 = vmul.f32 %v224_v46, %v208_v45  ;;  %v607_v46 = vld [vmem:[#allocation13 + $0x3] ss:$8 sm:$0x3] }
 0x156   :  { %231 = vrot.lane.b32.xlu1 %v227_v47, %s1025_s21  ;;  %v526_v47 = vld [vmem:[#allocation12 + $0x10] sm:$0xff] }
 0x1c5   :  { %v234_v48 = vpop.permute.xlu0 %233 }
 0x1c8   :  { %v232_v49 = vpop.permute.xlu1 %231 }
 0x1c9   :  { %v235_v50 = vsel %vm107_vm0, %v232_v49, %v234_v48  ;;  %239 = vst.msk [vmem:[#allocation3] sm:$0xff] %vm238_vm8, %v232_v49  ;;  %v612_v48 = vrot.slane %v607_v46, %v1123_v13  ;;  %v616_v49 = vrot.slane %v607_v46, %v1125_v14 }
 0x1ca   :  { %241 = vst.msk [vmem:[#allocation3 + $0x8] sm:$0xff] %vm240_vm9, %v235_v50 }
 0x1d0   :  { %v242_v51 = vld [vmem:[#allocation3] sm:$0xff] }
 0x1d1   :  { %253 = vrot.lane.b32.xlu1 %v242_v51, %s1034_s7  ;;  %v243_v52 = vld [vmem:[#allocation3 + $0x8] sm:$0xff] }
 0x1d2   :  { %255 = vrot.lane.b32.xlu0 %v243_v52, %s1034_s7 }
 0x1d5   :  { %246 = vrot.lane.b32.xlu1 %v242_v51, %s1035_s13 }
 0x1d6   :  { %248 = vrot.lane.b32.xlu0 %v243_v52, %s1035_s13 }
 0x1d9   :  { %264 = vperm.xlu1 %886, %v261_v54  }
 0x1da   :  { %353 = vrot.lane.b32.xlu0 %v348_v55, %s1035_s13 }
 0x1dd   :  { %355 = vrot.lane.b32.xlu1 %v352_v56, %s1035_s13  ;;  %v524_v56 = vld [vmem:[#allocation10 + $0x10] sm:$0xff] }
 0x243   :  { %v254_v57 = vpop.permute.xlu1 %253 }
 0x244   :  { %v256_v58 = vpop.permute.xlu0 %255 }
 0x245   :  { %297 = vmatprep.subr.mxu0 %v256_v58  ;;  %v257_v59 = vsel %vm196_vm7, %v254_v57, %v256_v58 }
 0x246   :  { %298 = vmatpush1.msra.mxu0 %v257_v59 }
 0x247   :  { %v247_v60 = vpop.permute.xlu1 %246 }
 0x248   :  { %v249_v61 = vpop.permute.xlu0 %248 }
 0x249   :  { %299 = vmatprep.subr.mxu0 %v249_v61  ;;  %v250_v62 = vsel %vm178_vm6, %v247_v60, %v249_v61 }
 0x24a   :  { %300 = vmatpush1.msra.mxu0 %v250_v62 }
 0x24b   :  { %301 = vmatprep.subr.mxu0 %v243_v52 }
 0x24c   :  { %302 = vmatpush1.msra.mxu0 %v242_v51  ;;  %v354_v5 = vpop.permute.xlu0 %353 }
 0x24d   :  { %862 = vmatmul.mubr.msk.f32.vlgmr.msra.gmra.mxu0 %vm267_vm10, %v260_v63 }
 0x24e   :  { %599 = vmatprep.mubr.f32.mxu0 %v1031_v4 }
 0x254   :  { %v265_v0 = vpop.permute.xlu1 %264 }
 0x258   :  { %v356_v1 = vpop.permute.xlu1 %355 }
 0x259   :  { %v357_v7 = vsel %vm178_vm6, %v354_v5, %v356_v1 }
 0x30d   :  { %v337_v6 = vpop.f32.mrf.mxu0 }
 0x30e   :  { %v338_v9 = vadd.f32 %v337_v6, %v265_v0 }
 0x30f   :  { %v339_v10 = vpop.f32.mrf.mxu0 }
 0x310   :  { %v340_v11 = vadd.f32 %v339_v10, %v265_v0  ;;  %v360_v12 = vmul.f32 %v357_v7, %v338_v9 }
 0x312   :  { %364 = vrot.lane.b32.xlu0 %v360_v12, %s1025_s21  ;;  %v361_v15 = vmul.f32 %v356_v1, %v340_v11  ;;  %v739_v11 = vld [vmem:[#allocation13 + $0x4] ss:$8 sm:$0x3]  ;;  %v658_v12 = vld [vmem:[#allocation12 + $0x18] sm:$0xff] }
 0x314   :  { %366 = vrot.lane.b32.xlu1 %v361_v15, %s1025_s21  ;;  %v744_v15 = vrot.slane %v739_v11, %v1123_v13 }
 0x384   :  { %v365_v16 = vpop.permute.xlu0 %364 }
 0x385   :  { %371 = vst.msk [vmem:[#allocation2] sm:$0xff] %vm238_vm8, %v365_v16 }
 0x386   :  { %v367_v17 = vpop.permute.xlu1 %366 }
 0x387   :  { %v368_v18 = vsel %vm107_vm0, %v365_v16, %v367_v17  ;;  %v748_v16 = vrot.slane %v739_v11, %v1125_v14 }
 0x388   :  { %372 = vst.msk [vmem:[#allocation2 + $0x8] sm:$0xff] %vm240_vm9, %v368_v18 }
 0x38c   :  { %v373_v19 = vld [vmem:[#allocation2] sm:$0xff] }
 0x38d   :  { %384 = vrot.lane.b32.xlu0 %v373_v19, %s1034_s7 }
 0x38f   :  { %v374_v20 = vld [vmem:[#allocation2 + $0x8] sm:$0xff] }
 0x390   :  { %386 = vrot.lane.b32.xlu1 %v374_v20, %s1034_s7 }
 0x391   :  { %377 = vrot.lane.b32.xlu0 %v373_v19, %s1035_s13 }
 0x394   :  { %379 = vrot.lane.b32.xlu1 %v374_v20, %s1035_s13 }
 0x395   :  { %397 = vperm.xlu0 %885, %v394_v22  }
 0x398   :  { %485 = vrot.lane.b32.xlu1 %v480_v23, %s1035_s13  ;;  %v656_v23 = vld [vmem:[#allocation10 + $0x18] sm:$0xff] }
 0x399   :  { %487 = vrot.lane.b32.xlu0 %v484_v24, %s1035_s13 }
 0x3ff   :  { %v385_v25 = vpop.permute.xlu0 %384 }
 0x402   :  { %v387_v26 = vpop.permute.xlu1 %386 }
 0x403   :  { %429 = vmatprep.subr.mxu1 %v387_v26  ;;  %v388_v27 = vsel %vm196_vm7, %v385_v25, %v387_v26  ;;  %v378_v28 = vpop.permute.xlu0 %377 }
 0x404   :  { %430 = vmatpush1.msra.mxu1 %v388_v27 }
 0x406   :  { %v380_v29 = vpop.permute.xlu1 %379 }
 0x407   :  { %431 = vmatprep.subr.mxu1 %v380_v29  ;;  %v381_v30 = vsel %vm178_vm6, %v378_v28, %v380_v29 }
 0x408   :  { %432 = vmatpush1.msra.mxu1 %v381_v30 }
 0x409   :  { %433 = vmatprep.subr.mxu1 %v374_v20 }
 0x40a   :  { %434 = vmatpush1.msra.mxu1 %v373_v19  ;;  %v486_v34 = vpop.permute.xlu1 %485 }
 0x40b   :  { %863 = vmatmul.mubr.msk.f32.vlgmr.msra.gmra.mxu1 %vm267_vm10, %v392_v31 }
 0x40c   :  { %731 = vmatprep.mubr.f32.mxu1 %v1031_v4 }
 0x410   :  { %v398_v32 = vpop.permute.xlu0 %397 }
 0x414   :  { %v488_v33 = vpop.permute.xlu0 %487 }
 0x415   :  { %v489_v36 = vsel %vm178_vm6, %v486_v34, %v488_v33 }
 0x4cb   :  { %v469_v35 = vpop.f32.mrf.mxu1 }
 0x4cc   :  { %v470_v37 = vadd.f32 %v469_v35, %v398_v32 }
 0x4cd   :  { %v471_v38 = vpop.f32.mrf.mxu1 }
 0x4ce   :  { %v472_v39 = vadd.f32 %v471_v38, %v398_v32  ;;  %v492_v40 = vmul.f32 %v489_v36, %v470_v37  ;;  %v769_v32 = vld [vmem:[%s1240_s5] sm:$0xff] }
 0x4d0   :  { %496 = vrot.lane.b32.xlu1 %v492_v40, %s1025_s21  ;;  %v493_v41 = vmul.f32 %v488_v33, %v472_v39 }
 0x4d2   :  { %498 = vrot.lane.b32.xlu0 %v493_v41, %s1025_s21 }
 0x542   :  { %v497_v42 = vpop.permute.xlu1 %496 }
 0x543   :  { %503 = vst.msk [vmem:[#allocation3] sm:$0xff] %vm238_vm8, %v497_v42 }
 0x544   :  { %v499_v43 = vpop.permute.xlu0 %498 }
 0x545   :  { %v500_v4 = vsel %vm107_vm0, %v497_v42, %v499_v43  ;;  %v829_v43 = vld [vmem:[#allocation4] sm:$0x1] }
 0x546   :  { %504 = vst.msk [vmem:[#allocation3 + $0x8] sm:$0xff] %vm240_vm9, %v500_v4 }
 0x54a   :  { %v505_v44 = vld [vmem:[#allocation3] sm:$0xff] }
 0x54b   :  { %516 = vrot.lane.b32.xlu1 %v505_v44, %s1034_s7 }
 0x54d   :  { %v506_v45 = vld [vmem:[#allocation3 + $0x8] sm:$0xff] }
 0x54e   :  { %518 = vrot.lane.b32.xlu0 %v506_v45, %s1034_s7 }
 0x54f   :  { %509 = vrot.lane.b32.xlu1 %v505_v44, %s1035_s13 }
 0x552   :  { %511 = vrot.lane.b32.xlu0 %v506_v45, %s1035_s13 }
 0x553   :  { %529 = vperm.xlu1 %886, %v526_v47  }
 0x556   :  { %617 = vrot.lane.b32.xlu0 %v612_v48, %s1035_s13 }
 0x557   :  { %619 = vrot.lane.b32.xlu1 %v616_v49, %s1035_s13 }
 0x558   :  { %887 = vset.pattern.permute.xlu1 %v1029_v2 }
 0x5bd   :  { %v517_v50 = vpop.permute.xlu1 %516 }
 0x5c0   :  { %v519_v51 = vpop.permute.xlu0 %518 }
 0x5c1   :  { %v520_v52 = vsel %vm196_vm7, %v517_v50, %v519_v51  ;;  %561 = vmatprep.subr.mxu0 %v519_v51  ;;  %v510_v53 = vpop.permute.xlu1 %509 }
 0x5c2   :  { %562 = vmatpush1.msra.mxu0 %v520_v52 }
 0x5c4   :  { %v512_v54 = vpop.permute.xlu0 %511 }
 0x5c5   :  { %v513_v55 = vsel %vm178_vm6, %v510_v53, %v512_v54  ;;  %563 = vmatprep.subr.mxu0 %v512_v54 }
 0x5c6   :  { %564 = vmatpush1.msra.mxu0 %v513_v55 }
 0x5c7   :  { %565 = vmatprep.subr.mxu0 %v506_v45 }
 0x5c8   :  { %566 = vmatpush1.msra.mxu0 %v505_v44  ;;  %v618_v2 = vpop.permute.xlu0 %617 }
 0x5c9   :  { %864 = vmatmul.mubr.msk.f32.vlgmr.msra.gmra.mxu0 %vm267_vm10, %v524_v56 }
 0x5ce   :  { %v530_v57 = vpop.permute.xlu1 %529 }
 0x5d2   :  { %v620_v58 = vpop.permute.xlu1 %619 }
 0x5d3   :  { %v621_v60 = vsel %vm178_vm6, %v618_v2, %v620_v58 }
 0x689   :  { %v601_v59 = vpop.f32.mrf.mxu0 }
 0x68a   :  { %v602_v61 = vadd.f32 %v601_v59, %v530_v57 }
 0x68b   :  { %v603_v62 = vpop.f32.mrf.mxu0 }
 0x68c   :  { %v604_v63 = vadd.f32 %v603_v62, %v530_v57  ;;  %v624_v0 = vmul.f32 %v621_v60, %v602_v61 }
 0x68e   :  { %628 = vrot.lane.b32.xlu0 %v624_v0, %s1025_s21  ;;  %v625_v1 = vmul.f32 %v620_v58, %v604_v63 }
 0x690   :  { %630 = vrot.lane.b32.xlu1 %v625_v1, %s1025_s21 }
 0x700   :  { %v629_v5 = vpop.permute.xlu0 %628 }
 0x701   :  { %635 = vst.msk [vmem:[#allocation2] sm:$0xff] %vm238_vm8, %v629_v5 }
 0x702   :  { %v631_v6 = vpop.permute.xlu1 %630 }
 0x703   :  { %v632_v7 = vsel %vm107_vm0, %v629_v5, %v631_v6 }
 0x704   :  { %636 = vst.msk [vmem:[#allocation2 + $0x8] sm:$0xff] %vm240_vm9, %v632_v7 }
 0x708   :  { %v637_v9 = vld [vmem:[#allocation2] sm:$0xff] }
 0x709   :  { %648 = vrot.lane.b32.xlu0 %v637_v9, %s1034_s7 }
 0x70b   :  { %v638_v10 = vld [vmem:[#allocation2 + $0x8] sm:$0xff] }
 0x70c   :  { %650 = vrot.lane.b32.xlu1 %v638_v10, %s1034_s7 }
 0x70d   :  { %641 = vrot.lane.b32.xlu0 %v637_v9, %s1035_s13 }
 0x710   :  { %643 = vrot.lane.b32.xlu1 %v638_v10, %s1035_s13 }
 0x711   :  { %661 = vperm.xlu0 %885, %v658_v12  }
 0x714   :  { %749 = vrot.lane.b32.xlu1 %v744_v15, %s1035_s13 }
 0x715   :  { %751 = vrot.lane.b32.xlu0 %v748_v16, %s1035_s13 }
 0x716   :  { %888 = vset.pattern.permute.xlu0 %v1032_v8 }
 0x77b   :  { %v649_v17 = vpop.permute.xlu0 %648 }
 0x77e   :  { %v651_v18 = vpop.permute.xlu1 %650 }
 0x77f   :  { %v652_v19 = vsel %vm196_vm7, %v649_v17, %v651_v18  ;;  %693 = vmatprep.subr.mxu1 %v651_v18  ;;  %v642_v20 = vpop.permute.xlu0 %641 }
 0x780   :  { %694 = vmatpush1.msra.mxu1 %v652_v19 }
 0x782   :  { %v644_v21 = vpop.permute.xlu1 %643 }
 0x783   :  { %v645_v22 = vsel %vm178_vm6, %v642_v20, %v644_v21  ;;  %695 = vmatprep.subr.mxu1 %v644_v21 }
 0x784   :  { %696 = vmatpush1.msra.mxu1 %v645_v22 }
 0x785   :  { %697 = vmatprep.subr.mxu1 %v638_v10 }
 0x786   :  { %698 = vmatpush1.msra.mxu1 %v637_v9  ;;  %v750_v8 = vpop.permute.xlu1 %749 }
 0x787   :  { %865 = vmatmul.mubr.msk.f32.vlgmr.msra.gmra.mxu1 %vm267_vm10, %v656_v23 }
 0x78c   :  { %v662_v14 = vpop.permute.xlu0 %661 }
 0x790   :  { %v752_v24 = vpop.permute.xlu0 %751 }
 0x791   :  { %v753_v26 = vsel %vm178_vm6, %v750_v8, %v752_v24 }
 0x847   :  { %v733_v25 = vpop.f32.mrf.mxu1 }
 0x848   :  { %v734_v27 = vadd.f32 %v733_v25, %v662_v14 }
 0x849   :  { %v735_v28 = vpop.f32.mrf.mxu1 }
 0x84a   :  { %v736_v29 = vadd.f32 %v735_v28, %v662_v14  ;;  %v756_v30 = vmul.f32 %v753_v26, %v734_v27 }
 0x84c   :  { %760 = vrot.lane.b32.xlu1 %v756_v30, %s1025_s21  ;;  %v757_v31 = vmul.f32 %v752_v24, %v736_v29 }
 0x84e   :  { %762 = vrot.lane.b32.xlu0 %v757_v31, %s1025_s21 }
 0x850   :  { %782 = vperm.xlu1 %887, %v769_v32  }
 0x852   :  { %799 = vperm.xlu0 %888, %v769_v32  }
 0x854   :  { %889 = vset.pattern.permute.xlu1 %v1030_v3 }
 0x855   :  { %774 = vperm.xlu1 %889, %v769_v32  }
 0x856   :  { %890 = vset.pattern.permute.xlu0 %v1030_v3 }
 0x8be   :  { %v761_v33 = vpop.permute.xlu1 %760 }
 0x8bf   :  { %767 = vst.msk [vmem:[#allocation3] sm:$0xff] %vm238_vm8, %v761_v33 }
 0x8c0   :  { %v763_v34 = vpop.permute.xlu0 %762 }
 0x8c1   :  { %v764_v35 = vsel %vm107_vm0, %v761_v33, %v763_v34 }
 0x8c2   :  { %768 = vst.msk [vmem:[#allocation3 + $0x8] sm:$0xff] %vm240_vm9, %v764_v35 }
 0x8c6   :  { %v770_v36 = vld [vmem:[#allocation3] sm:$0xff] }
 0x8c9   :  { %v771_v37 = vld [vmem:[#allocation3 + $0x8] sm:$0xff] }
 0x8cb   :  { %v783_v38 = vpop.permute.xlu1 %782 }
 0x8cc   :  { %v785_v39 = vmul.f32 %v783_v38, %v770_v36  ;;  %v786_v40 = vmul.f32 %v783_v38, %v771_v37 }
 0x8cd   :  { %v800_v41 = vpop.permute.xlu0 %799 }
 0x8ce   :  { %791 = vrot.lane.b32.xlu0 %v786_v40, %s1035_s13  ;;  %789 = vrot.lane.b32.xlu1 %v785_v39, %s1035_s13  ;;  %v802_v42 = vmul.f32 %v800_v41, %v770_v36  ;;  %v803_v3 = vmul.f32 %v800_v41, %v771_v37 }
 0x8d0   :  { %v775_v4 = vpop.permute.xlu1 %774 }
 0x8d1   :  { %v778_v46 = vmul.f32 %v775_v4, %v771_v37  ;;  %v777_v48 = vmul.f32 %v775_v4, %v770_v36 }
 0x8d2   :  { %808 = vrot.lane.b32.xlu0 %v803_v3, %s1034_s7  ;;  %806 = vrot.lane.b32.xlu1 %v802_v42, %s1034_s7 }
 0x8d6   :  { %832 = vperm.xlu1 %889, %v829_v43  }
 0x940   :  { %v792_v44 = vpop.permute.xlu0 %791  ;;  %v790_v45 = vpop.permute.xlu1 %789 }
 0x941   :  { %v793_v47 = vsel %vm178_vm6, %v790_v45, %v792_v44  ;;  %v797_v49 = vadd.f32 %v792_v44, %v778_v46 }
 0x942   :  { %v796_v50 = vadd.f32 %v793_v47, %v777_v48 }
 0x944   :  { %v809_v51 = vpop.permute.xlu0 %808  ;;  %v807_v52 = vpop.permute.xlu1 %806 }
 0x945   :  { %v814_v53 = vadd.f32 %v809_v51, %v797_v49  ;;  %v810_v54 = vsel %vm196_vm7, %v807_v52, %v809_v51 }
 0x946   :  { %v813_v55 = vadd.f32 %v810_v54, %v796_v50 }
 0x947   :  { %v822_v56 = vsel %vm821_vm11, %v814_v53, 0.0 }
 0x948   :  { %v823_v57 = vrot.slane %v822_v56, 4  ;;  %v815_v58 = vrot.slane %v813_v55, 4 }
 0x94a   :  { %v824_v2 = vadd.f32 %v823_v57, %v822_v56  ;;  %v816_v59 = vadd.f32 %v815_v58, %v813_v55 }
 0x94c   :  { %v825_v60 = vrot.slane %v824_v2, 2  ;;  %v817_v61 = vrot.slane %v816_v59, 2 }
 0x94e   :  { %v818_v62 = vadd.f32 %v817_v61, %v816_v59  ;;  %v826_v63 = vadd.f32 %v825_v60, %v824_v2 }
 0x950   :  { %v819_v0 = vrot.slane %v818_v62, 1  ;;  %v827_v1 = vrot.slane %v826_v63, 1 }
 0x951   :  { %v833_v5 = vpop.permute.xlu1 %832 }
 0x952   :  { %v820_v6 = vadd.f32 %v819_v0, %v818_v62  ;;  %v828_v7 = vadd.f32 %v827_v1, %v826_v63  ;;  %v838_v9 = vrot.slane %v833_v5, %v1123_v13 }
 0x954   :  { %v839_v10 = vadd.f32 %v838_v9, %v820_v6  ;;  %v840_v11 = vadd.f32 %v838_v9, %v828_v7 }
 0x956   :  { %845 = vrot.lane.b32.xlu1 %v840_v11, %s1034_s7  ;;  %843 = vrot.lane.b32.xlu0 %v839_v10, %s1034_s7 }
 0x9c8   :  { %v846_v12 = vpop.permute.xlu1 %845  ;;  %v844_v15 = vpop.permute.xlu0 %843 }
 0x9c9   :  { %v847_v16 = vsel %vm196_vm7, %v844_v15, %v846_v12 }
 0x9ca   :  { %v850_v17 = vsel %vm849_vm12, %v839_v10, %v847_v16 }
 0x9cb   :  { %851 = vst [vmem:[%s1243_s8] sm:$0x1] %v850_v17 }
 0x9cc   :  { %856 = vsyncpa [#allocation6], 1 }
 0x9cd   :  { %857 = vsyncpa [#allocation8], 1 }
 0x9ce   :  { %858 = vsyncpa [#allocation11], 1 }
 0x9cf   :  { %859 = vsyncpa [#allocation14], 1 }

</bundles_post_ra>
